<compile_context>
chip_gen: v7x
topology: tpu7x:2x2x1
jax: 0.10.0
libtpu: 0.0.40
codegen_flags: <defaults>
</compile_context>

<pallas_src>
import functools
import math

import numpy as np
import jax
import jax.numpy as jnp
from jax.experimental import pallas as pl
from jax.experimental.pallas import tpu as pltpu

LANE = 128  # TPU lane width; pad H and C to multiples of this.


# ----------------------------- Pallas kernel -------------------------------

def pinn_kernel(x_ref, w1_ref, b1_ref, w2_ref, b2_ref,
                wn_ref, bn_ref, wo_ref, o_ref, *, n_layers):
    x = x_ref[...]                                     # (TILE_N, 1) f32

    # P1Basis forward (n_dim == 1 -> the "linear" is a broadcast multiply).
    vl = x * w1_ref[...] + b1_ref[...]                 # (TILE_N, Hp)
    vr = x * w2_ref[...] + b2_ref[...]                 # (TILE_N, Hp)
    phis = jnp.maximum(vl - jnp.maximum(vl - vr, 0.0), 0.0)

    # Hidden network: the same Linear + Tanh applied n_layers times (shared
    # weights).  Loads hoisted once; static unrolled loop for LLO visibility.
    wn = wn_ref[...]                                   # (Hp, Hp)
    bn = bn_ref[...]                                   # (1, Hp)
    h = phis
    for _ in range(n_layers):                          # static, tiny trip count
        h = jnp.tanh(jnp.dot(h, wn, preferred_element_type=jnp.float32) + bn)

    # Output layer (no bias), lane-dense (Cp = 128-padded) store.
    o_ref[...] = jnp.dot(h, wo_ref[...], preferred_element_type=jnp.float32)


# ------------------------------- wrapper ------------------------------------

def _round_up(v, m):
    return (v + m - 1) // m * m


def _pad_params(params):
    """Zero-pad H and C up to 128-lane multiples (numerically exact)."""
    H = params["wn"].shape[0]
    C = params["wo"].shape[1]
    Hp = _round_up(H, LANE)
    Cp = _round_up(C, LANE)
    pad_lane = lambda a: jnp.pad(a, ((0, 0), (0, Hp - H)))
    padded = {
        "w1": pad_lane(params["w1"]), "b1": pad_lane(params["b1"]),
        "w2": pad_lane(params["w2"]), "b2": pad_lane(params["b2"]),
        "wn": jnp.pad(params["wn"], ((0, Hp - H), (0, Hp - H))),
        "bn": pad_lane(params["bn"]),
        "wo": jnp.pad(params["wo"], ((0, Hp - H), (0, Cp - C))),
    }
    return padded, Hp, Cp


@functools.partial(jax.jit, static_argnames=("n_layers", "tile_n"))
def pinn_forward(x, params, n_layers, tile_n=128):
    N = x.shape[0]
    C = params["wo"].shape[1]

    p, Hp, Cp = _pad_params(params)
    Np = _round_up(max(N, tile_n), tile_n)
    x_p = jnp.pad(x, ((0, Np - N), (0, 0)))            # padded rows -> sliced off

    kern = functools.partial(pinn_kernel, n_layers=n_layers)
    full = lambda shape: pl.BlockSpec(shape, lambda i: (0, 0))  # resident block

    cost = pl.CostEstimate(
        flops=2 * Np * Hp * (2 + n_layers * Hp + Cp),
        transcendentals=Np * Hp * n_layers,
        bytes_accessed=4 * (Np + 5 * Hp + Hp * Hp + Hp * Cp + Np * Cp),
    )

    out = pl.pallas_call(
        kern,
        out_shape=jax.ShapeDtypeStruct((Np, Cp), jnp.float32),
        grid_spec=pltpu.PrefetchScalarGridSpec(
            num_scalar_prefetch=0,
            grid=(Np // tile_n,),
            in_specs=[
                pl.BlockSpec((tile_n, 1), lambda i: (i, 0)),   # x tiles over N
                full((1, Hp)), full((1, Hp)),                  # w1, b1
                full((1, Hp)), full((1, Hp)),                  # w2, b2
                full((Hp, Hp)), full((1, Hp)),                 # wn, bn
                full((Hp, Cp)),                                # wo
            ],
            out_specs=pl.BlockSpec((tile_n, Cp), lambda i: (i, 0)),
        ),
        compiler_params=pltpu.CompilerParams(
            dimension_semantics=("parallel",)),                # v7x: 2 TCs
        cost_estimate=cost,
    )(x_p, p["w1"], p["b1"], p["w2"], p["b2"], p["wn"], p["bn"], p["wo"])

    return out[:N, :C]


# ------------------------- deterministic parameters ------------------------

def p1basis_params(a, b, n_neurons):
    """Exactly the deterministic P1Basis.__init__ weight construction."""
    pos = np.linspace(a, b, n_neurons)
    xpos = np.empty(n_neurons + 2, dtype=np.float64)
    xpos[1:-1] = pos
    xpos[0] = 2.0 * pos[0] - pos[1]
    xpos[-1] = 2.0 * pos[-1] - pos[-2]
    h = xpos[1:] - xpos[:-1]
    bias1 = xpos[2:] / h[1:]              # (H,)
    weight1 = -1.0 / h[1:]                # (H,)   == weight1[:, 0] in torch
    bias2 = -xpos[:-2] / h[:-1]           # (H,)
    weight2 = 1.0 / h[:-1]                # (H,)
    f32 = lambda v: jnp.asarray(v, jnp.float32).reshape(1, -1)
    return f32(weight1), f32(bias1), f32(weight2), f32(bias2)


def make_params(key, n_neurons, ncomp, a, b):
    w1, b1, w2, b2 = p1basis_params(a, b, n_neurons)
    kn_w, kn_b, ko_w = jax.random.split(key, 3)
    # torch.nn.Linear default init: U(-1/sqrt(fan_in), 1/sqrt(fan_in))
    k = 1.0 / math.sqrt(n_neurons)
    wn = jax.random.uniform(kn_w, (n_neurons, n_neurons), jnp.float32, -k, k)  # (in, out)
    bn = jax.random.uniform(kn_b, (1, n_neurons), jnp.float32, -k, k)
    wo = jax.random.uniform(ko_w, (n_neurons, ncomp), jnp.float32, -k, k)      # (in, out)
    return {"w1": w1, "b1": b1, "w2": w2, "b2": b2, "wn": wn, "bn": bn, "wo": wo}


# ------------------------------ reference ----------------------------------

def pinn_reference(x, params, n_layers):
    vl = x * params["w1"] + params["b1"]
    vr = x * params["w2"] + params["b2"]
    h = jnp.maximum(vl - jnp.maximum(vl - vr, 0.0), 0.0)
    for _ in range(n_layers):
        h = jnp.tanh(h @ params["wn"] + params["bn"])
    return h @ params["wo"]


# ------------------------------- main ---------------------------------------

if __name__ == "__main__":
    # Config consistent with PINN(app, n_neurons=H, n_layers=2) where
    # app.domain = [0, 1] and app.u0 has 2 components (ncomp = 2).
    # N_POINTS is deliberately not a multiple of the tile to exercise padding.
    N_POINTS = 500        # collocation points (rows of x)
    N_NEURONS = 32        # hidden width H (= n_basis); padded to 128 internally
    N_LAYERS = 2
    NCOMP = 2             # padded to 128 lanes internally, sliced back to 2
    A, B = 0.0, 1.0

    key = jax.random.PRNGKey(0)
    k_x, k_p = jax.random.split(key)

    x = jax.random.uniform(k_x, (N_POINTS, 1), jnp.float32, A, B)
    params = make_params(k_p, N_NEURONS, NCOMP, A, B)

    out = pinn_forward(x, params, N_LAYERS)
    out = jax.block_until_ready(out)

    ref = pinn_reference(x, params, N_LAYERS)
    np.testing.assert_allclose(np.asarray(out), np.asarray(ref), rtol=1e-5, atol=1e-5)

    # TODO(synk): P1Basis quadrature tables / autograd basis derivatives and the
    # residual/Jacobian training path are init/training-time machinery, not part
    # of the forward pass, and are intentionally not implemented as kernels.
    print("KERNEL_OK")
</pallas_src>

<mosaic_0001>
module attributes {stable_mosaic.version = 11 : i64} {
  func.func @pinn_kernel(%arg0: i32, %arg1: memref<128x1xf32, #tpu.memory_space<vmem>>, %arg2: memref<1x128xf32, #tpu.memory_space<vmem>>, %arg3: memref<1x128xf32, #tpu.memory_space<vmem>>, %arg4: memref<1x128xf32, #tpu.memory_space<vmem>>, %arg5: memref<1x128xf32, #tpu.memory_space<vmem>>, %arg6: memref<128x128xf32, #tpu.memory_space<vmem>>, %arg7: memref<1x128xf32, #tpu.memory_space<vmem>>, %arg8: memref<128x128xf32, #tpu.memory_space<vmem>>, %arg9: memref<128x128xf32, #tpu.memory_space<vmem>>) attributes {dimension_semantics = [#tpu.dimension_semantics<parallel>], iteration_bounds = array<i64: 4>, scalar_prefetch = 0 : i64, scratch_operands = 0 : i64, tpu.core_type = #tpu.core_type<tc>, window_params = [{transform_indices = @transform_0, window_bounds = array<i64: 128, 1>}, {pipeline_mode = #tpu.pipeline_mode<synchronous>, transform_indices = @transform_1, window_bounds = array<i64: 1, 128>}, {pipeline_mode = #tpu.pipeline_mode<synchronous>, transform_indices = @transform_2, window_bounds = array<i64: 1, 128>}, {pipeline_mode = #tpu.pipeline_mode<synchronous>, transform_indices = @transform_3, window_bounds = array<i64: 1, 128>}, {pipeline_mode = #tpu.pipeline_mode<synchronous>, transform_indices = @transform_4, window_bounds = array<i64: 1, 128>}, {pipeline_mode = #tpu.pipeline_mode<synchronous>, transform_indices = @transform_5, window_bounds = array<i64: 128, 128>}, {pipeline_mode = #tpu.pipeline_mode<synchronous>, transform_indices = @transform_6, window_bounds = array<i64: 1, 128>}, {pipeline_mode = #tpu.pipeline_mode<synchronous>, transform_indices = @transform_7, window_bounds = array<i64: 128, 128>}, {transform_indices = @transform_8, window_bounds = array<i64: 128, 128>}]} {
    %c0 = arith.constant 0 : index
    %c0_0 = arith.constant 0 : index
    %0 = vector.load %arg1[%c0, %c0_0] : memref<128x1xf32, #tpu.memory_space<vmem>>, vector<128x1xf32>
    %c0_1 = arith.constant 0 : index
    %c0_2 = arith.constant 0 : index
    %1 = vector.load %arg2[%c0_1, %c0_2] : memref<1x128xf32, #tpu.memory_space<vmem>>, vector<1x128xf32>
    %2 = vector.broadcast %0 : vector<128x1xf32> to vector<128x128xf32>
    %3 = vector.broadcast %1 : vector<1x128xf32> to vector<128x128xf32>
    %4 = arith.mulf %2, %3 : vector<128x128xf32>
    %c0_3 = arith.constant 0 : index
    %c0_4 = arith.constant 0 : index
    %5 = vector.load %arg3[%c0_3, %c0_4] : memref<1x128xf32, #tpu.memory_space<vmem>>, vector<1x128xf32>
    %6 = vector.broadcast %5 : vector<1x128xf32> to vector<128x128xf32>
    %7 = arith.addf %4, %6 : vector<128x128xf32>
    %c0_5 = arith.constant 0 : index
    %c0_6 = arith.constant 0 : index
    %8 = vector.load %arg4[%c0_5, %c0_6] : memref<1x128xf32, #tpu.memory_space<vmem>>, vector<1x128xf32>
    %9 = vector.broadcast %0 : vector<128x1xf32> to vector<128x128xf32>
    %10 = vector.broadcast %8 : vector<1x128xf32> to vector<128x128xf32>
    %11 = arith.mulf %9, %10 : vector<128x128xf32>
    %c0_7 = arith.constant 0 : index
    %c0_8 = arith.constant 0 : index
    %12 = vector.load %arg5[%c0_7, %c0_8] : memref<1x128xf32, #tpu.memory_space<vmem>>, vector<1x128xf32>
    %13 = vector.broadcast %12 : vector<1x128xf32> to vector<128x128xf32>
    %14 = arith.addf %11, %13 : vector<128x128xf32>
    %15 = arith.subf %7, %14 : vector<128x128xf32>
    %cst = arith.constant 0.000000e+00 : f32
    %16 = vector.broadcast %cst : f32 to vector<128x128xf32>
    %17 = arith.maximumf %15, %16 : vector<128x128xf32>
    %18 = arith.subf %7, %17 : vector<128x128xf32>
    %cst_9 = arith.constant 0.000000e+00 : f32
    %19 = vector.broadcast %cst_9 : f32 to vector<128x128xf32>
    %20 = arith.maximumf %18, %19 : vector<128x128xf32>
    %c0_10 = arith.constant 0 : index
    %c0_11 = arith.constant 0 : index
    %21 = vector.load %arg6[%c0_10, %c0_11] : memref<128x128xf32, #tpu.memory_space<vmem>>, vector<128x128xf32>
    %c0_12 = arith.constant 0 : index
    %c0_13 = arith.constant 0 : index
    %22 = vector.load %arg7[%c0_12, %c0_13] : memref<1x128xf32, #tpu.memory_space<vmem>>, vector<1x128xf32>
    %cst_14 = arith.constant dense<0.000000e+00> : vector<128x128xf32>
    %23 = tpu.matmul %20, %21, %cst_14 {dimension_numbers = #tpu.dot_dimension_numbers<[1], [0], [0], [1], [0, 0, 1, 1], [], []>} : vector<128x128xf32>, vector<128x128xf32>, vector<128x128xf32> -> vector<128x128xf32>
    %24 = vector.broadcast %22 : vector<1x128xf32> to vector<128x128xf32>
    %25 = arith.addf %23, %24 : vector<128x128xf32>
    %26 = math.tanh %25 : vector<128x128xf32>
    %cst_15 = arith.constant dense<0.000000e+00> : vector<128x128xf32>
    %27 = tpu.matmul %26, %21, %cst_15 {dimension_numbers = #tpu.dot_dimension_numbers<[1], [0], [0], [1], [0, 0, 1, 1], [], []>} : vector<128x128xf32>, vector<128x128xf32>, vector<128x128xf32> -> vector<128x128xf32>
    %28 = vector.broadcast %22 : vector<1x128xf32> to vector<128x128xf32>
    %29 = arith.addf %27, %28 : vector<128x128xf32>
    %30 = math.tanh %29 : vector<128x128xf32>
    %c0_16 = arith.constant 0 : index
    %c0_17 = arith.constant 0 : index
    %31 = vector.load %arg8[%c0_16, %c0_17] : memref<128x128xf32, #tpu.memory_space<vmem>>, vector<128x128xf32>
    %cst_18 = arith.constant dense<0.000000e+00> : vector<128x128xf32>
    %32 = tpu.matmul %30, %31, %cst_18 {dimension_numbers = #tpu.dot_dimension_numbers<[1], [0], [0], [1], [0, 0, 1, 1], [], []>} : vector<128x128xf32>, vector<128x128xf32>, vector<128x128xf32> -> vector<128x128xf32>
    %c0_19 = arith.constant 0 : index
    %c0_20 = arith.constant 0 : index
    %33 = vector.load %arg9[%c0_19, %c0_20] : memref<128x128xf32, #tpu.memory_space<vmem>>, vector<128x128xf32>
    tpu.vector_store %arg9[%c0_19, %c0_20], %32 {strides = array<i32>} : memref<128x128xf32, #tpu.memory_space<vmem>>, vector<128x128xf32>,
    return
  }
  func.func @transform_0(%arg0: i32) -> (i32, i32) {
    %c0_i32 = arith.constant 0 : i32
    %c0_i32_0 = arith.constant 0 : i32
    return %arg0, %c0_i32 : i32, i32
  }
  func.func @transform_1(%arg0: i32) -> (i32, i32) {
    %c0_i32 = arith.constant 0 : i32
    %c0_i32_0 = arith.constant 0 : i32
    %c0_i32_1 = arith.constant 0 : i32
    return %c0_i32, %c0_i32_0 : i32, i32
  }
  func.func @transform_2(%arg0: i32) -> (i32, i32) {
    %c0_i32 = arith.constant 0 : i32
    %c0_i32_0 = arith.constant 0 : i32
    %c0_i32_1 = arith.constant 0 : i32
    return %c0_i32, %c0_i32_0 : i32, i32
  }
  func.func @transform_3(%arg0: i32) -> (i32, i32) {
    %c0_i32 = arith.constant 0 : i32
    %c0_i32_0 = arith.constant 0 : i32
    %c0_i32_1 = arith.constant 0 : i32
    return %c0_i32, %c0_i32_0 : i32, i32
  }
  func.func @transform_4(%arg0: i32) -> (i32, i32) {
    %c0_i32 = arith.constant 0 : i32
    %c0_i32_0 = arith.constant 0 : i32
    %c0_i32_1 = arith.constant 0 : i32
    return %c0_i32, %c0_i32_0 : i32, i32
  }
  func.func @transform_5(%arg0: i32) -> (i32, i32) {
    %c0_i32 = arith.constant 0 : i32
    %c0_i32_0 = arith.constant 0 : i32
    %c0_i32_1 = arith.constant 0 : i32
    return %c0_i32, %c0_i32_0 : i32, i32
  }
  func.func @transform_6(%arg0: i32) -> (i32, i32) {
    %c0_i32 = arith.constant 0 : i32
    %c0_i32_0 = arith.constant 0 : i32
    %c0_i32_1 = arith.constant 0 : i32
    return %c0_i32, %c0_i32_0 : i32, i32
  }
  func.func @transform_7(%arg0: i32) -> (i32, i32) {
    %c0_i32 = arith.constant 0 : i32
    %c0_i32_0 = arith.constant 0 : i32
    %c0_i32_1 = arith.constant 0 : i32
    return %c0_i32, %c0_i32_0 : i32, i32
  }
  func.func @transform_8(%arg0: i32) -> (i32, i32) {
    %c0_i32 = arith.constant 0 : i32
    %c0_i32_0 = arith.constant 0 : i32
    return %arg0, %c0_i32 : i32, i32
  }
}

</mosaic_0001>

<bundles_post_ra>
// kernel: pinn_forward.1
= control target key start
LH: loop header
LB: loop body
LE: loop exit
PB: predicated region body
PF: predicated region fallthrough
CT: control target
= control target key end

     0   :  { %s1660_s27 = smov 0   ;;  %s1953_s0 = inlined_call_operand.vmem [shape: f32[512,1], index: 0, kind: input, shape index: {}]   ;;  %s1954_s1 = inlined_call_operand.vmem [shape: f32[1,128], index: 1, kind: input, shape index: {}]   ;;  %s1955_s2 = inlined_call_operand.vmem [shape: f32[1,128], index: 2, kind: input, shape index: {}]   ;;  %s1956_s3 = inlined_call_operand.vmem [shape: f32[1,128], index: 3, kind: input, shape index: {}]   ;;  %s1957_s4 = inlined_call_operand.vmem [shape: f32[1,128], index: 4, kind: input, shape index: {}]   ;;  %s1958_s5 = inlined_call_operand.vmem [shape: f32[128,128], index: 5, kind: input, shape index: {}]   ;;  %s1959_s6 = inlined_call_operand.vmem [shape: f32[1,128], index: 6, kind: input, shape index: {}]   ;;  %s1960_s7 = inlined_call_operand.vmem [shape: f32[128,128], index: 7, kind: input, shape index: {}]   ;;  %s1961_s8 = inlined_call_operand.vmem [shape: f32[512,128], index: 8, kind: output, shape index: {}]  }
   0x1 LB: > { %s1139_s28 = sadd.s32 4294967295, %s1612_s27   ;;  %p1143_p0 = scmp.ge.s32.totalorder %s1612_s27, 1  ;;  %s1612_s27 = sphi %s1660_s27, %s18_s27  }
   0x2   : > { %p263_p1 = scmp.lt.s32.totalorder %s1612_s27, 5 }
   0x4   : > { %p264_p2 = pnand %p1143_p0, %p263_p1 }
   0x5   : > { %s1144_s29 = sshll.u32 (!%p264_p2), %s1139_s28, 4  ;;  %v561_v0 = vld [vmem:[%s1958_s5] sm:$0xff] (!%p264_p2)  ;;  %v562_v1 = vld [vmem:[%s1958_s5 + $0x8] sm:$0xff] (!%p264_p2)  ;;  %v563_v2 = vld [vmem:[%s1958_s5 + $0x10] sm:$0xff] (!%p264_p2)  ;;  %v1614_v3 = vmov (!%p264_p2), 0  }
   0x6   : > { %267 = sbr.rel (%p264_p2) target bundleno = 858 (0x35a), region = 52  ;;  %1541 = vset.pattern.permute.xlu1 (!%p264_p2), %v1614_v3  ;;  %1540 = vset.pattern.permute.xlu0 (!%p264_p2), %v1614_v3  ;;  %p298_p3 = scmp.lt.s32.totalorder (!%p264_p2), %s1144_s29, 63  ;;  %v1419_v4 = vpack.c.bf16 (!%p264_p2), %v562_v1, %v561_v0  ;;  %v564_v5 = vld [vmem:[%s1958_s5 + $0x18] sm:$0xff] (!%p264_p2)  ;;  %v565_v7 = vld [vmem:[%s1958_s5 + $0x20] sm:$0xff] (!%p264_p2)  ;;  %v566_v8 = vld [vmem:[%s1958_s5 + $0x28] sm:$0xff] (!%p264_p2) }
   0x7   : > { %v1423_v6 = vpack.c.bf16 (!%p264_p2), %v564_v5, %v563_v2  ;;  %v1427_v9 = vpack.c.bf16 (!%p264_p2), %v566_v8, %v565_v7  ;;  %v567_v10 = vld [vmem:[%s1958_s5 + $0x30] sm:$0xff] (!%p264_p2)  ;;  %v568_v13 = vld [vmem:[%s1958_s5 + $0x38] sm:$0xff] (!%p264_p2)  ;;  %v569_v17 = vld [vmem:[%s1958_s5 + $0x40] sm:$0xff] (!%p264_p2) }
   0x8   : > { %1420 = vmatprep.subr.bf16.mxu0 (!%p264_p2), %v1419_v4  ;;  %1452 = vmatprep.subr.bf16.mxu1 (!%p264_p2), %v1419_v4  ;;  %v1431_v16 = vpack.c.bf16 (!%p264_p2), %v568_v13, %v567_v10  ;;  %v570_v18 = vld [vmem:[%s1958_s5 + $0x48] sm:$0xff] (!%p264_p2)  ;;  %v571_v22 = vld [vmem:[%s1958_s5 + $0x50] sm:$0xff] (!%p264_p2)  ;;  %v572_v23 = vld [vmem:[%s1958_s5 + $0x58] sm:$0xff] (!%p264_p2) }
   0x9   : > { %1422 = vmatpush3.bf16.msra.mxu0 (!%p264_p2), %v1419_v4  ;;  %1454 = vmatpush3.bf16.msra.mxu1 (!%p264_p2), %v1419_v4  ;;  %v1435_v21 = vpack.c.bf16 (!%p264_p2), %v570_v18, %v569_v17  ;;  %v1439_v26 = vpack.c.bf16 (!%p264_p2), %v572_v23, %v571_v22  ;;  %v573_v27 = vld [vmem:[%s1958_s5 + $0x60] sm:$0xff] (!%p264_p2)  ;;  %v574_v28 = vld [vmem:[%s1958_s5 + $0x68] sm:$0xff] (!%p264_p2)  ;;  %v575_v32 = vld [vmem:[%s1958_s5 + $0x70] sm:$0xff] (!%p264_p2) }
   0xa   : > { %1424 = vmatprep.subr.bf16.mxu0 (!%p264_p2), %v1423_v6  ;;  %1456 = vmatprep.subr.bf16.mxu1 (!%p264_p2), %v1423_v6  ;;  %v1443_v31 = vpack.c.bf16 (!%p264_p2), %v574_v28, %v573_v27  ;;  %v576_v33 = vld [vmem:[%s1958_s5 + $0x78] sm:$0xff] (!%p264_p2)  ;;  %v1745_v41 = vld [vmem:[%s1954_s1] ss:$0 sm:$0xff] (!%p264_p2) }
   0xb   : > { %v1447_v36 = vpack.c.bf16 (!%p264_p2), %v576_v33, %v575_v32  ;;  %v1750_v42 = vld [vmem:[%s1956_s3] ss:$0 sm:$0xff] (!%p264_p2) }
   0xc   : > { %v1755_v43 = vld [vmem:[%s1955_s2] ss:$0 sm:$0xff] (!%p264_p2) }
   0xd   : > { %s1963_s29 = smov (!%p298_p3, %s1144_s29), 63  ;;  %1426 = vmatpush3.bf16.msra.mxu0 %v1423_v6  ;;  %1458 = vmatpush3.bf16.msra.mxu1 %v1423_v6  ;;  %v1760_v44 = vld [vmem:[%s1957_s4] ss:$0 sm:$0xff] }
   0xe   : > { %s1145_s20 = sshll.u32 %s1963_s29, 3  ;;  %1428 = vmatprep.subr.bf16.mxu0 %v1427_v9  ;;  %1460 = vmatprep.subr.bf16.mxu1 %v1427_v9 }
   0xf   : > { %s1694_s23 = scalar_lea.vmem %s1953_s0, %s1145_s20 }
  0x10   : > { %v311_v11 = vld [vmem:[%s1694_s23 + $0x10] sm:$0xff]  ;;  %v309_v12 = vld [vmem:[%s1694_s23] sm:$0xff]  ;;  %v312_v14 = vld [vmem:[%s1694_s23 + $0x18] sm:$0xff] }
  0x11   : > { %338 = vperm.xlu1 %1541, %v311_v11   ;;  %328 = vperm.xlu0 %1540, %v309_v12   ;;  %v310_v15 = vld [vmem:[%s1694_s23 + $0x8] sm:$0xff]  ;;  %v313_v20 = vld [vmem:[%s1694_s23 + $0x20] sm:$0xff]  ;;  %v316_v24 = vld [vmem:[%s1694_s23 + $0x38] sm:$0xff] }
  0x12   : > { %v314_v19 = vld [vmem:[%s1694_s23 + $0x28] sm:$0xff]  ;;  %1430 = vmatpush3.bf16.msra.mxu0 %v1427_v9  ;;  %1462 = vmatpush3.bf16.msra.mxu1 %v1427_v9  ;;  %v315_v25 = vld [vmem:[%s1694_s23 + $0x30] sm:$0xff]  ;;  %v317_v30 = vld [vmem:[%s1694_s23 + $0x40] sm:$0xff] }
  0x13   : > { %1432 = vmatprep.subr.bf16.mxu0 %v1431_v16  ;;  %1464 = vmatprep.subr.bf16.mxu1 %v1431_v16  ;;  %v318_v29 = vld [vmem:[%s1694_s23 + $0x48] sm:$0xff]  ;;  %v320_v34 = vld [vmem:[%s1694_s23 + $0x58] sm:$0xff]  ;;  %v319_v35 = vld [vmem:[%s1694_s23 + $0x50] sm:$0xff] }
  0x14   : > { %v322_v37 = vld [vmem:[%s1694_s23 + $0x68] sm:$0xff]  ;;  %v321_v38 = vld [vmem:[%s1694_s23 + $0x60] sm:$0xff]  ;;  %v324_v39 = vld [vmem:[%s1694_s23 + $0x78] sm:$0xff] }
  0x15   : > { %343 = vperm.xlu1 %1541, %v312_v14   ;;  %333 = vperm.xlu0 %1540, %v310_v15   ;;  %v323_v40 = vld [vmem:[%s1694_s23 + $0x70] sm:$0xff]  ;;  %s1932_s23 = scalar_lea.vmem %s1961_s8, %s1145_s20 }
  0x16   : > { %1434 = vmatpush3.bf16.msra.mxu0 %v1431_v16  ;;  %1466 = vmatpush3.bf16.msra.mxu1 %v1431_v16 }
  0x17   : > { %1436 = vmatprep.subr.bf16.mxu0 %v1435_v21  ;;  %1468 = vmatprep.subr.bf16.mxu1 %v1435_v21 }
  0x19   : > { %353 = vperm.xlu1 %1541, %v314_v19   ;;  %348 = vperm.xlu0 %1540, %v313_v20  }
  0x1a   : > { %1438 = vmatpush3.bf16.msra.mxu0 %v1435_v21  ;;  %1470 = vmatpush3.bf16.msra.mxu1 %v1435_v21 }
  0x1b   : > { %1440 = vmatprep.subr.bf16.mxu0 %v1439_v26  ;;  %1472 = vmatprep.subr.bf16.mxu1 %v1439_v26 }
  0x1d   : > { %363 = vperm.xlu1 %1541, %v316_v24   ;;  %358 = vperm.xlu0 %1540, %v315_v25  }
  0x1e   : > { %1442 = vmatpush3.bf16.msra.mxu0 %v1439_v26  ;;  %1474 = vmatpush3.bf16.msra.mxu1 %v1439_v26 }
  0x1f   : > { %1444 = vmatprep.subr.bf16.mxu0 %v1443_v31  ;;  %1476 = vmatprep.subr.bf16.mxu1 %v1443_v31 }
  0x21   : > { %373 = vperm.xlu1 %1541, %v318_v29   ;;  %368 = vperm.xlu0 %1540, %v317_v30  }
  0x22   : > { %1446 = vmatpush3.bf16.msra.mxu0 %v1443_v31  ;;  %1478 = vmatpush3.bf16.msra.mxu1 %v1443_v31 }
  0x23   : > { %1448 = vmatprep.subr.bf16.mxu0 %v1447_v36  ;;  %1480 = vmatprep.subr.bf16.mxu1 %v1447_v36 }
  0x25   : > { %383 = vperm.xlu1 %1541, %v320_v34   ;;  %378 = vperm.xlu0 %1540, %v319_v35  }
  0x26   : > { %1450 = vmatpush3.bf16.msra.mxu0 %v1447_v36  ;;  %1482 = vmatpush3.bf16.msra.mxu1 %v1447_v36 }
  0x29   : > { %393 = vperm.xlu1 %1541, %v322_v37   ;;  %388 = vperm.xlu0 %1540, %v321_v38  }
  0x2d   : > { %403 = vperm.xlu1 %1541, %v324_v39   ;;  %398 = vperm.xlu0 %1540, %v323_v40  }
  0x90   : > { %v339_v45 = vpop.permute.xlu1 %338  ;;  %v329_v46 = vpop.permute.xlu0 %328 }
  0x91   : > { %v414_v47 = vmul.f32 %v1745_v41, %v339_v45  ;;  %v460_v48 = vmul.f32 %v1750_v42, %v339_v45  ;;  %v412_v49 = vmul.f32 %v1745_v41, %v329_v46  ;;  %v458_v50 = vmul.f32 %v1750_v42, %v329_v46 }
  0x93   : > { %v437_v51 = vadd.f32 %v1755_v43, %v414_v47  ;;  %v483_v52 = vadd.f32 %v1760_v44, %v460_v48  ;;  %v481_v53 = vadd.f32 %v1760_v44, %v458_v50  ;;  %v435_v54 = vadd.f32 %v1755_v43, %v412_v49 }
  0x94   : > { %v344_v55 = vpop.permute.xlu1 %343  ;;  %v334_v56 = vpop.permute.xlu0 %333 }
  0x95   : > { %v499_v57 = vsub.f32 %v437_v51, %v483_v52  ;;  %v415_v58 = vmul.f32 %v1745_v41, %v344_v55  ;;  %v461_v59 = vmul.f32 %v1750_v42, %v344_v55  ;;  %v413_v60 = vmul.f32 %v1745_v41, %v334_v56 }
  0x96   : > { %v459_v61 = vmul.f32 %v1750_v42, %v334_v56  ;;  %v497_v62 = vsub.f32 %v435_v54, %v481_v53 }
  0x97   : > { %v438_v63 = vadd.f32 %v1755_v43, %v415_v58  ;;  %v484_v0 = vadd.f32 %v1760_v44, %v461_v59  ;;  %v436_v1 = vadd.f32 %v1755_v43, %v413_v60  ;;  %v515_v2 = vmax.f32 %v499_v57, 0.0 }
  0x98   : > { %v482_v3 = vadd.f32 %v1760_v44, %v459_v61  ;;  %v354_v4 = vpop.permute.xlu1 %353  ;;  %v349_v5 = vpop.permute.xlu0 %348  ;;  %v513_v6 = vmax.f32 %v497_v62, 0.0 }
  0x99   : > { %v500_v7 = vsub.f32 %v438_v63, %v484_v0  ;;  %v417_v8 = vmul.f32 %v1745_v41, %v354_v4  ;;  %v463_v9 = vmul.f32 %v1750_v42, %v354_v4  ;;  %v416_v10 = vmul.f32 %v1745_v41, %v349_v5 }
  0x9a   : > { %v498_v11 = vsub.f32 %v436_v1, %v482_v3  ;;  %v462_v12 = vmul.f32 %v1750_v42, %v349_v5  ;;  %v529_v13 = vsub.f32 %v435_v54, %v513_v6  ;;  %v531_v23 = vsub.f32 %v437_v51, %v515_v2 }
  0x9b   : > { %v516_v14 = vmax.f32 %v500_v7, 0.0  ;;  %v440_v15 = vadd.f32 %v1755_v43, %v417_v8  ;;  %v486_v16 = vadd.f32 %v1760_v44, %v463_v9  ;;  %v439_v17 = vadd.f32 %v1755_v43, %v416_v10 }
  0x9c   : > { %v514_v18 = vmax.f32 %v498_v11, 0.0  ;;  %v485_v19 = vadd.f32 %v1760_v44, %v462_v12  ;;  %v364_v20 = vpop.permute.xlu1 %363  ;;  %v359_v21 = vpop.permute.xlu0 %358  ;;  %v545_v22 = vmax.f32 %v529_v13, 0.0  ;;  %v547_v45 = vmax.f32 %v531_v23, 0.0 }
  0x9d   : > { %v502_v24 = vsub.f32 %v440_v15, %v486_v16  ;;  %v419_v25 = vmul.f32 %v1745_v41, %v364_v20  ;;  %v465_v26 = vmul.f32 %v1750_v42, %v364_v20  ;;  %v418_v27 = vmul.f32 %v1745_v41, %v359_v21 }
  0x9e   : > { %v501_v28 = vsub.f32 %v439_v17, %v485_v19  ;;  %v464_v29 = vmul.f32 %v1750_v42, %v359_v21  ;;  %1283 = vmatprep.mubr.f32.mxu0 %v545_v22  ;;  %v530_v30 = vsub.f32 %v436_v1, %v514_v18  ;;  %v532_v31 = vsub.f32 %v438_v63, %v516_v14 }
  0x9f   : > { %v518_v32 = vmax.f32 %v502_v24, 0.0  ;;  %v1791_v33 = vadd.f32 %v1755_v43, %v419_v25  ;;  %v488_v34 = vadd.f32 %v1760_v44, %v465_v26  ;;  %v441_v35 = vadd.f32 %v1755_v43, %v418_v27 }
  0xa0   : > { %v517_v36 = vmax.f32 %v501_v28, 0.0  ;;  %v487_v37 = vadd.f32 %v1760_v44, %v464_v29  ;;  %v374_v38 = vpop.permute.xlu1 %373  ;;  %v369_v39 = vpop.permute.xlu0 %368  ;;  %v546_v40 = vmax.f32 %v530_v30, 0.0  ;;  %v548_v57 = vmax.f32 %v532_v31, 0.0 }
  0xa1   : > { %v504_v46 = vsub.f32 %v1791_v33, %v488_v34  ;;  %v421_v47 = vmul.f32 %v1745_v41, %v374_v38  ;;  %v467_v48 = vmul.f32 %v1750_v42, %v374_v38  ;;  %v420_v49 = vmul.f32 %v1745_v41, %v369_v39 }
  0xa2   : > { %v503_v50 = vsub.f32 %v441_v35, %v487_v37  ;;  %v466_v51 = vmul.f32 %v1750_v42, %v369_v39  ;;  %1284 = vmatmul.mubr.f32.vlgmr.msra.gmra.mrb[0].mxu0 %v546_v40  ;;  %v533_v52 = vsub.f32 %v439_v17, %v517_v36  ;;  %v534_v53 = vsub.f32 %v440_v15, %v518_v32 }
  0xa3   : > { %v444_v54 = vadd.f32 %v1755_v43, %v421_v47  ;;  %v490_v55 = vadd.f32 %v1760_v44, %v467_v48  ;;  %v443_v56 = vadd.f32 %v1755_v43, %v420_v49  ;;  %1286 = vmatprep.mubr.f32.mxu0 %v547_v45  ;;  %v520_v58 = vmax.f32 %v504_v46, 0.0 }
  0xa4   : > { %v519_v59 = vmax.f32 %v503_v50, 0.0  ;;  %v489_v60 = vadd.f32 %v1760_v44, %v466_v51  ;;  %v384_v61 = vpop.permute.xlu1 %383  ;;  %v379_v62 = vpop.permute.xlu0 %378  ;;  %v549_v63 = vmax.f32 %v533_v52, 0.0  ;;  %v550_v6 = vmax.f32 %v534_v53, 0.0 }
  0xa5   : > { %v506_v0 = vsub.f32 %v444_v54, %v490_v55  ;;  %v423_v1 = vmul.f32 %v1745_v41, %v384_v61  ;;  %v469_v2 = vmul.f32 %v1750_v42, %v384_v61  ;;  %v422_v3 = vmul.f32 %v1745_v41, %v379_v62 }
  0xa6   : > { %v505_v4 = vsub.f32 %v443_v56, %v489_v60  ;;  %v468_v5 = vmul.f32 %v1750_v42, %v379_v62  ;;  %1287 = vmatmul.mubr.f32.gmra.mrb[2].mxu0 %v548_v57  ;;  %v535_v7 = vsub.f32 %v441_v35, %v519_v59  ;;  %v536_v17 = vsub.f32 %v1791_v33, %v520_v58 }
  0xa7   : > { %v522_v8 = vmax.f32 %v506_v0, 0.0  ;;  %v446_v9 = vadd.f32 %v1755_v43, %v423_v1  ;;  %v492_v10 = vadd.f32 %v1760_v44, %v469_v2  ;;  %v445_v11 = vadd.f32 %v1755_v43, %v422_v3  ;;  %1289 = vmatprep.mubr.f32.mxu0 %v549_v63  ;;  %v906_v1 = vld [vmem:[%s1960_s7] sm:$0xff]  ;;  %v907_v2 = vld [vmem:[%s1960_s7 + $0x8] sm:$0xff]  ;;  %v908_v3 = vld [vmem:[%s1960_s7 + $0x10] sm:$0xff] }
  0xa8   : > { %v521_v12 = vmax.f32 %v505_v4, 0.0  ;;  %v491_v13 = vadd.f32 %v1760_v44, %v468_v5  ;;  %v394_v14 = vpop.permute.xlu1 %393  ;;  %v389_v15 = vpop.permute.xlu0 %388  ;;  %v551_v16 = vmax.f32 %v535_v7, 0.0  ;;  %v552_v34 = vmax.f32 %v536_v17, 0.0  ;;  %v909_v5 = vld [vmem:[%s1960_s7 + $0x18] sm:$0xff]  ;;  %v910_v7 = vld [vmem:[%s1960_s7 + $0x20] sm:$0xff] }
  0xa9   : > { %v508_v18 = vsub.f32 %v446_v9, %v492_v10  ;;  %v425_v19 = vmul.f32 %v1745_v41, %v394_v14  ;;  %v471_v20 = vmul.f32 %v1750_v42, %v394_v14  ;;  %v424_v21 = vmul.f32 %v1745_v41, %v389_v15  ;;  %v912_v10 = vld [vmem:[%s1960_s7 + $0x30] sm:$0xff] }
  0xaa   : > { %v507_v22 = vsub.f32 %v445_v11, %v491_v13  ;;  %v470_v23 = vmul.f32 %v1750_v42, %v389_v15  ;;  %1290 = vmatmul.mubr.f32.gmra.mrb[4].mxu0 %v550_v6  ;;  %v537_v24 = vsub.f32 %v443_v56, %v521_v12  ;;  %v538_v25 = vsub.f32 %v444_v54, %v522_v8  ;;  %v911_v8 = vld [vmem:[%s1960_s7 + $0x28] sm:$0xff]  ;;  %v1865_v13 = vld [vmem:[%s1959_s6] ss:$0 sm:$0xff] }
  0xab   : > { %v524_v26 = vmax.f32 %v508_v18, 0.0  ;;  %v448_v27 = vadd.f32 %v1755_v43, %v425_v19  ;;  %v494_v28 = vadd.f32 %v1760_v44, %v471_v20  ;;  %v447_v29 = vadd.f32 %v1755_v43, %v424_v21  ;;  %1292 = vmatprep.mubr.f32.mxu0 %v551_v16 }
  0xac   : > { %v523_v30 = vmax.f32 %v507_v22, 0.0  ;;  %v493_v31 = vadd.f32 %v1760_v44, %v470_v23  ;;  %v404_v32 = vpop.permute.xlu1 %403  ;;  %v399_v33 = vpop.permute.xlu0 %398  ;;  %v553_v35 = vmax.f32 %v537_v24, 0.0  ;;  %v554_v46 = vmax.f32 %v538_v25, 0.0 }
  0xad   : > { %v510_v36 = vsub.f32 %v448_v27, %v494_v28  ;;  %v427_v37 = vmul.f32 %v1745_v41, %v404_v32  ;;  %v473_v38 = vmul.f32 %v1750_v42, %v404_v32  ;;  %v426_v39 = vmul.f32 %v1745_v41, %v399_v33 }
  0xae   : > { %v509_v40 = vsub.f32 %v447_v29, %v493_v31  ;;  %v472_v45 = vmul.f32 %v1750_v42, %v399_v33  ;;  %1293 = vmatmul.mubr.f32.gmra.mrb[6].mxu0 %v552_v34  ;;  %v539_v47 = vsub.f32 %v445_v11, %v523_v30  ;;  %v540_v51 = vsub.f32 %v446_v9, %v524_v26  ;;  %v913_v11 = vld [vmem:[%s1960_s7 + $0x38] sm:$0xff] }
  0xaf   : > { %v450_v48 = vadd.f32 %v1755_v43, %v427_v37  ;;  %v496_v49 = vadd.f32 %v1760_v44, %v473_v38  ;;  %v449_v50 = vadd.f32 %v1755_v43, %v426_v39  ;;  %1295 = vmatprep.mubr.f32.mxu0 %v553_v35  ;;  %v526_v52 = vmax.f32 %v510_v36, 0.0 }
  0xb0   : > { %v525_v53 = vmax.f32 %v509_v40, 0.0  ;;  %v495_v54 = vadd.f32 %v1760_v44, %v472_v45  ;;  %v555_v55 = vmax.f32 %v539_v47, 0.0  ;;  %v556_v57 = vmax.f32 %v540_v51, 0.0 }
  0xb1   : > { %v512_v41 = vsub.f32 %v450_v48, %v496_v49  ;;  %v542_v61 = vsub.f32 %v448_v27, %v526_v52  ;;  %v1483_v4 = vpack.c.bf16 %v907_v2, %v906_v1  ;;  %v1487_v6 = vpack.c.bf16 %v909_v5, %v908_v3  ;;  %v916_v1 = vld [vmem:[%s1960_s7 + $0x50] sm:$0xff]  ;;  %v917_v2 = vld [vmem:[%s1960_s7 + $0x58] sm:$0xff]  ;;  %v919_v5 = vld [vmem:[%s1960_s7 + $0x68] sm:$0xff] }
  0xb2   : > { %v511_v56 = vsub.f32 %v449_v50, %v495_v54  ;;  %1296 = vmatmul.mubr.f32.gmra.mrb[8].mxu0 %v554_v46  ;;  %v541_v42 = vsub.f32 %v447_v29, %v525_v53  ;;  %v1848_v9 = vpack.c.bf16 %v911_v8, %v910_v7  ;;  %v1857_v12 = vpack.c.bf16 %v913_v11, %v912_v10  ;;  %v920_v7 = vld [vmem:[%s1960_s7 + $0x70] sm:$0xff]  ;;  %v921_v8 = vld [vmem:[%s1960_s7 + $0x78] sm:$0xff] }
  0xb3   : > { %1298 = vmatprep.mubr.f32.mxu0 %v555_v55  ;;  %v528_v58 = vmax.f32 %v512_v41, 0.0  ;;  %v558_v43 = vmax.f32 %v542_v61, 0.0  ;;  %1484 = vmatprep.subr.bf16.mxu0 %v1483_v4  ;;  %v1503_v3 = vpack.c.bf16 %v917_v2, %v916_v1 }
  0xb4   : > { %v527_v59 = vmax.f32 %v511_v56, 0.0  ;;  %v557_v60 = vmax.f32 %v541_v42, 0.0  ;;  %1515 = vmatprep.subr.bf16.mxu1 %v1483_v4  ;;  %1486 = vmatpush3.bf16.msra.mxu0 %v1483_v4 }
  0xb5   : > { %v544_v0 = vsub.f32 %v450_v48, %v528_v58  ;;  %1488 = vmatprep.subr.bf16.mxu0 %v1487_v6 }
  0xb6   : > { %1299 = vmatmul.mubr.f32.gmra.mrb[10].mxu0 %v556_v57  ;;  %v543_v62 = vsub.f32 %v449_v50, %v527_v59 }
  0xb7   : > { %1301 = vmatprep.mubr.f32.mxu0 %v557_v60  ;;  %v560_v44 = vmax.f32 %v544_v0, 0.0  ;;  %v915_v0 = vld [vmem:[%s1960_s7 + $0x48] sm:$0xff] }
  0xb8   : > { %v559_v63 = vmax.f32 %v543_v62, 0.0  ;;  %1490 = vmatpush3.bf16.msra.mxu0 %v1487_v6 }
  0xb9   : > { %1492 = vmatprep.subr.bf16.mxu0 %v1848_v9 }
  0xba   : > { %1302 = vmatmul.mubr.f32.gmra.mrb[12].mxu0 %v558_v43 }
  0xbb   : > { %1304 = vmatprep.mubr.f32.mxu0 %v559_v63  ;;  %v914_v63 = vld [vmem:[%s1960_s7 + $0x40] sm:$0xff] }
  0xbc   : > { %1494 = vmatpush3.bf16.msra.mxu0 %v1848_v9 }
  0xbd   : > { %1496 = vmatprep.subr.bf16.mxu0 %v1857_v12 }
  0xbe   : > { %1305 = vmatmul.mubr.f32.gmra.mrb[14].mxu0 %v560_v44  ;;  %v1499_v44 = vpack.c.bf16 %v915_v0, %v914_v63 }
  0xc0   : > { %1498 = vmatpush3.bf16.msra.mxu0 %v1857_v12 }
  0xc1   : > { %1500 = vmatprep.subr.bf16.mxu0 %v1499_v44 }
  0xc4   : > { %1502 = vmatpush3.bf16.msra.mxu0 %v1499_v44 }
  0xc5   : > { %1504 = vmatprep.subr.bf16.mxu0 %v1503_v3 }
  0xc8   : > { %1506 = vmatpush3.bf16.msra.mxu0 %v1503_v3 }
 0x175   : > { %v1285_v14 = vpop.f32.mrb[0].mxu0 }
 0x176   : > { %v656_v15 = vadd.f32 %v1285_v14, %v1865_v13  ;;  %v650_v16 = vpop.f32.mrb[1].mxu0 }
 0x177   : > { %v651_v17 = vadd.f32 %v1865_v13, %v650_v16 }
 0x179   : > { %1542 = vtanh.f32 %v651_v17  ;;  %v1288_v18 = vpop.f32.mrb[2].mxu0 }
 0x17a   : > { %1544 = vtanh.f32 %v656_v15  ;;  %v666_v19 = vadd.f32 %v1288_v18, %v1865_v13  ;;  %v660_v20 = vpop.f32.mrb[3].mxu0 }
 0x17b   : > { %v661_v21 = vadd.f32 %v1865_v13, %v660_v20 }
 0x17d   : > { %1546 = vtanh.f32 %v661_v21  ;;  %v1291_v22 = vpop.f32.mrb[4].mxu0 }
 0x17e   : > { %1548 = vtanh.f32 %v666_v19  ;;  %v676_v23 = vadd.f32 %v1291_v22, %v1865_v13  ;;  %v670_v24 = vpop.f32.mrb[5].mxu0 }
 0x17f   : > { %v671_v25 = vadd.f32 %v1865_v13, %v670_v24 }
 0x181   : > { %1550 = vtanh.f32 %v671_v25  ;;  %v1294_v26 = vpop.f32.mrb[6].mxu0 }
 0x182   : > { %1552 = vtanh.f32 %v676_v23  ;;  %v686_v27 = vadd.f32 %v1294_v26, %v1865_v13  ;;  %v680_v28 = vpop.f32.mrb[7].mxu0 }
 0x183   : > { %v1543_v29 = vpop.eup %1542  ;;  %v681_v30 = vadd.f32 %v1865_v13, %v680_v28 }
 0x184   : > { %v1545_v31 = vpop.eup %1544  ;;  %1339 = vmatprep.mubr.f32.mxu1 %v1543_v29 }
 0x185   : > { %1554 = vtanh.f32 %v681_v30  ;;  %v1297_v32 = vpop.f32.mrb[8].mxu0  ;;  %1340 = vmatmul.mubr.f32.vlgmr.msra.gmra.mrb[0].mxu1 %v1545_v31 }
 0x186   : > { %1556 = vtanh.f32 %v686_v27  ;;  %v696_v33 = vadd.f32 %v1297_v32, %v1865_v13  ;;  %v690_v34 = vpop.f32.mrb[9].mxu0  ;;  %1523 = vmatpush3.bf16.msra.mxu1 %v1483_v4  ;;  %v918_v4 = vld [vmem:[%s1960_s7 + $0x60] sm:$0xff] }
 0x187   : > { %v1547_v35 = vpop.eup %1546  ;;  %v691_v36 = vadd.f32 %v1865_v13, %v690_v34  ;;  %1516 = vmatprep.subr.bf16.mxu1 %v1487_v6 }
 0x188   : > { %v1549_v37 = vpop.eup %1548  ;;  %1342 = vmatprep.mubr.f32.mxu1 %v1547_v35 }
 0x189   : > { %1558 = vtanh.f32 %v691_v36  ;;  %v1300_v38 = vpop.f32.mrb[10].mxu0  ;;  %1343 = vmatmul.mubr.f32.gmra.mrb[2].mxu1 %v1549_v37 }
 0x18a   : > { %1560 = vtanh.f32 %v696_v33  ;;  %v706_v39 = vadd.f32 %v1300_v38, %v1865_v13  ;;  %v700_v40 = vpop.f32.mrb[11].mxu0  ;;  %1524 = vmatpush3.bf16.msra.mxu1 %v1487_v6  ;;  %v1507_v6 = vpack.c.bf16 %v919_v5, %v918_v4 }
 0x18b   : > { %v1551_v45 = vpop.eup %1550  ;;  %v701_v46 = vadd.f32 %v1865_v13, %v700_v40  ;;  %1517 = vmatprep.subr.bf16.mxu1 %v1848_v9 }
 0x18c   : > { %v1553_v47 = vpop.eup %1552  ;;  %1345 = vmatprep.mubr.f32.mxu1 %v1551_v45  ;;  %1508 = vmatprep.subr.bf16.mxu0 %v1507_v6 }
 0x18d   : > { %1562 = vtanh.f32 %v701_v46  ;;  %v1303_v48 = vpop.f32.mrb[12].mxu0  ;;  %1346 = vmatmul.mubr.f32.gmra.mrb[4].mxu1 %v1553_v47  ;;  %1510 = vmatpush3.bf16.msra.mxu0 %v1507_v6 }
 0x18e   : > { %1564 = vtanh.f32 %v706_v39  ;;  %v716_v49 = vadd.f32 %v1303_v48, %v1865_v13  ;;  %v710_v50 = vpop.f32.mrb[13].mxu0  ;;  %1525 = vmatpush3.bf16.msra.mxu1 %v1848_v9  ;;  %v1511_v9 = vpack.c.bf16 %v921_v8, %v920_v7 }
 0x18f   : > { %v1555_v51 = vpop.eup %1554  ;;  %v711_v52 = vadd.f32 %v1865_v13, %v710_v50  ;;  %1518 = vmatprep.subr.bf16.mxu1 %v1857_v12 }
 0x190   : > { %v1557_v53 = vpop.eup %1556  ;;  %1348 = vmatprep.mubr.f32.mxu1 %v1555_v51  ;;  %1512 = vmatprep.subr.bf16.mxu0 %v1511_v9 }
 0x191   : > { %1566 = vtanh.f32 %v711_v52  ;;  %v1306_v54 = vpop.f32.mrb[14].mxu0  ;;  %1349 = vmatmul.mubr.f32.gmra.mrb[6].mxu1 %v1557_v53  ;;  %1514 = vmatpush3.bf16.msra.mxu0 %v1511_v9 }
 0x192   : > { %1568 = vtanh.f32 %v716_v49  ;;  %v726_v55 = vadd.f32 %v1306_v54, %v1865_v13  ;;  %v720_v41 = vpop.f32.mrb[15].mxu0  ;;  %1526 = vmatpush3.bf16.msra.mxu1 %v1857_v12 }
 0x193   : > { %v1559_v56 = vpop.eup %1558  ;;  %v721_v42 = vadd.f32 %v1865_v13, %v720_v41  ;;  %1519 = vmatprep.subr.bf16.mxu1 %v1499_v44 }
 0x194   : > { %v1561_v57 = vpop.eup %1560  ;;  %1351 = vmatprep.mubr.f32.mxu1 %v1559_v56 }
 0x195   : > { %1570 = vtanh.f32 %v721_v42  ;;  %1352 = vmatmul.mubr.f32.gmra.mrb[8].mxu1 %v1561_v57 }
 0x196   : > { %1572 = vtanh.f32 %v726_v55  ;;  %1527 = vmatpush3.bf16.msra.mxu1 %v1499_v44 }
 0x197   : > { %v1563_v58 = vpop.eup %1562  ;;  %1520 = vmatprep.subr.bf16.mxu1 %v1503_v3 }
 0x198   : > { %v1565_v59 = vpop.eup %1564  ;;  %1354 = vmatprep.mubr.f32.mxu1 %v1563_v58 }
 0x199   : > { %1355 = vmatmul.mubr.f32.gmra.mrb[10].mxu1 %v1565_v59 }
 0x19a   : > { %1528 = vmatpush3.bf16.msra.mxu1 %v1503_v3 }
 0x19b   : > { %v1567_v60 = vpop.eup %1566  ;;  %1521 = vmatprep.subr.bf16.mxu1 %v1507_v6 }
 0x19c   : > { %v1569_v61 = vpop.eup %1568  ;;  %1357 = vmatprep.mubr.f32.mxu1 %v1567_v60 }
 0x19d   : > { %1358 = vmatmul.mubr.f32.gmra.mrb[12].mxu1 %v1569_v61 }
 0x19e   : > { %1529 = vmatpush3.bf16.msra.mxu1 %v1507_v6 }
 0x19f   : > { %v1571_v62 = vpop.eup %1570  ;;  %1522 = vmatprep.subr.bf16.mxu1 %v1511_v9 }
 0x1a0   : > { %v1573_v43 = vpop.eup %1572  ;;  %1360 = vmatprep.mubr.f32.mxu1 %v1571_v62 }
 0x1a1   : > { %1361 = vmatmul.mubr.f32.gmra.mrb[14].mxu1 %v1573_v43 }
 0x1a2   : > { %1530 = vmatpush3.bf16.msra.mxu1 %v1511_v9 }
 0x258   : > { %v1341_v10 = vpop.f32.mrb[0].mxu1 }
 0x259   : > { %v817_v11 = vadd.f32 %v1341_v10, %v1865_v13  ;;  %v811_v12 = vpop.f32.mrb[1].mxu1 }
 0x25a   : > { %v812_v14 = vadd.f32 %v1865_v13, %v811_v12 }
 0x25c   : > { %1574 = vtanh.f32 %v812_v14  ;;  %v1344_v15 = vpop.f32.mrb[2].mxu1 }
 0x25d   : > { %1576 = vtanh.f32 %v817_v11  ;;  %v827_v16 = vadd.f32 %v1344_v15, %v1865_v13  ;;  %v821_v17 = vpop.f32.mrb[3].mxu1 }
 0x25e   : > { %v822_v18 = vadd.f32 %v1865_v13, %v821_v17 }
 0x260   : > { %1578 = vtanh.f32 %v822_v18  ;;  %v1347_v19 = vpop.f32.mrb[4].mxu1 }
 0x261   : > { %1580 = vtanh.f32 %v827_v16  ;;  %v837_v20 = vadd.f32 %v1347_v19, %v1865_v13  ;;  %v831_v21 = vpop.f32.mrb[5].mxu1 }
 0x262   : > { %v832_v22 = vadd.f32 %v1865_v13, %v831_v21 }
 0x264   : > { %1582 = vtanh.f32 %v832_v22  ;;  %v1350_v23 = vpop.f32.mrb[6].mxu1 }
 0x265   : > { %1584 = vtanh.f32 %v837_v20  ;;  %v847_v24 = vadd.f32 %v1350_v23, %v1865_v13  ;;  %v841_v25 = vpop.f32.mrb[7].mxu1 }
 0x266   : > { %v1575_v26 = vpop.eup %1574  ;;  %v842_v27 = vadd.f32 %v1865_v13, %v841_v25 }
 0x267   : > { %v1577_v28 = vpop.eup %1576  ;;  %1395 = vmatprep.mubr.f32.mxu0 %v1575_v26 }
 0x268   : > { %1586 = vtanh.f32 %v842_v27  ;;  %v1353_v29 = vpop.f32.mrb[8].mxu1  ;;  %1396 = vmatmul.mubr.f32.vlgmr.msra.gmra.mrb[16].mxu0 %v1577_v28 }
 0x269   : > { %1588 = vtanh.f32 %v847_v24  ;;  %v857_v30 = vadd.f32 %v1353_v29, %v1865_v13  ;;  %v851_v31 = vpop.f32.mrb[9].mxu1 }
 0x26a   : > { %v1579_v32 = vpop.eup %1578  ;;  %v852_v33 = vadd.f32 %v1865_v13, %v851_v31 }
 0x26b   : > { %v1581_v34 = vpop.eup %1580  ;;  %1398 = vmatprep.mubr.f32.mxu0 %v1579_v32 }
 0x26c   : > { %1590 = vtanh.f32 %v852_v33  ;;  %v1356_v35 = vpop.f32.mrb[10].mxu1  ;;  %1399 = vmatmul.mubr.f32.gmra.mrb[18].mxu0 %v1581_v34 }
 0x26d   : > { %1592 = vtanh.f32 %v857_v30  ;;  %v867_v36 = vadd.f32 %v1356_v35, %v1865_v13  ;;  %v861_v37 = vpop.f32.mrb[11].mxu1 }
 0x26e   : > { %v1583_v38 = vpop.eup %1582  ;;  %v862_v39 = vadd.f32 %v1865_v13, %v861_v37 }
 0x26f   : > { %v1585_v40 = vpop.eup %1584  ;;  %1401 = vmatprep.mubr.f32.mxu0 %v1583_v38 }
 0x270   : > { %1594 = vtanh.f32 %v862_v39  ;;  %v1359_v45 = vpop.f32.mrb[12].mxu1  ;;  %1402 = vmatmul.mubr.f32.gmra.mrb[20].mxu0 %v1585_v40 }
 0x271   : > { %1596 = vtanh.f32 %v867_v36  ;;  %v877_v46 = vadd.f32 %v1359_v45, %v1865_v13  ;;  %v871_v47 = vpop.f32.mrb[13].mxu1 }
 0x272   : > { %v1587_v48 = vpop.eup %1586  ;;  %v872_v49 = vadd.f32 %v1865_v13, %v871_v47 }
 0x273   : > { %v1589_v50 = vpop.eup %1588  ;;  %1404 = vmatprep.mubr.f32.mxu0 %v1587_v48 }
 0x274   : > { %1598 = vtanh.f32 %v872_v49  ;;  %v1362_v51 = vpop.f32.mrb[14].mxu1  ;;  %1405 = vmatmul.mubr.f32.gmra.mrb[22].mxu0 %v1589_v50 }
 0x275   : > { %1600 = vtanh.f32 %v877_v46  ;;  %v887_v52 = vadd.f32 %v1362_v51, %v1865_v13  ;;  %v881_v53 = vpop.f32.mrb[15].mxu1 }
 0x276   : > { %v1591_v54 = vpop.eup %1590  ;;  %v882_v55 = vadd.f32 %v1865_v13, %v881_v53 }
 0x277   : > { %v1593_v41 = vpop.eup %1592  ;;  %1407 = vmatprep.mubr.f32.mxu1 %v1591_v54 }
 0x278   : > { %1602 = vtanh.f32 %v882_v55  ;;  %1408 = vmatmul.mubr.f32.vlgmr.msra.gmra.mrb[16].mxu1 %v1593_v41 }
 0x279   : > { %1604 = vtanh.f32 %v887_v52 }
 0x27a   : > { %v1595_v56 = vpop.eup %1594 }
 0x27b   : > { %v1597_v42 = vpop.eup %1596  ;;  %1410 = vmatprep.mubr.f32.mxu1 %v1595_v56 }
 0x27c   : > { %1411 = vmatmul.mubr.f32.gmra.mrb[18].mxu1 %v1597_v42 }
 0x27e   : > { %v1599_v57 = vpop.eup %1598 }
 0x27f   : > { %v1601_v58 = vpop.eup %1600  ;;  %1413 = vmatprep.mubr.f32.mxu1 %v1599_v57 }
 0x280   : > { %1414 = vmatmul.mubr.f32.gmra.mrb[20].mxu1 %v1601_v58 }
 0x282   : > { %v1603_v59 = vpop.eup %1602 }
 0x283   : > { %v1605_v60 = vpop.eup %1604  ;;  %1416 = vmatprep.mubr.f32.mxu1 %v1603_v59 }
 0x284   : > { %1417 = vmatmul.mubr.f32.gmra.mrb[22].mxu1 %v1605_v60 }
 0x33b   : > { %v1397_v13 = vpop.f32.mrb[16].mxu0 }
 0x33c   : > { %1068 = vst [vmem:[%s1932_s23 + $0x8] sm:$0xff] %v1397_v13  ;;  %v988_v61 = vpop.f32.mrb[17].mxu0 }
 0x33d   : > { %1067 = vst [vmem:[%s1932_s23] sm:$0xff] %v988_v61 }
 0x33f   : > { %v1400_v62 = vpop.f32.mrb[18].mxu0 }
 0x340   : > { %1070 = vst [vmem:[%s1932_s23 + $0x18] sm:$0xff] %v1400_v62  ;;  %v998_v43 = vpop.f32.mrb[19].mxu0 }
 0x341   : > { %1069 = vst [vmem:[%s1932_s23 + $0x10] sm:$0xff] %v998_v43 }
 0x343   : > { %v1403_v63 = vpop.f32.mrb[20].mxu0 }
 0x344   : > { %1072 = vst [vmem:[%s1932_s23 + $0x28] sm:$0xff] %v1403_v63  ;;  %v1008_v0 = vpop.f32.mrb[21].mxu0 }
 0x345   : > { %1071 = vst [vmem:[%s1932_s23 + $0x20] sm:$0xff] %v1008_v0 }
 0x347   : > { %v1406_v44 = vpop.f32.mrb[22].mxu0 }
 0x348   : > { %1074 = vst [vmem:[%s1932_s23 + $0x38] sm:$0xff] %v1406_v44  ;;  %v1018_v1 = vpop.f32.mrb[23].mxu0 }
 0x349   : > { %1073 = vst [vmem:[%s1932_s23 + $0x30] sm:$0xff] %v1018_v1 }
 0x34b   : > { %v1409_v2 = vpop.f32.mrb[16].mxu1 }
 0x34c   : > { %1076 = vst [vmem:[%s1932_s23 + $0x48] sm:$0xff] %v1409_v2  ;;  %v1028_v3 = vpop.f32.mrb[17].mxu1 }
 0x34d   : > { %1075 = vst [vmem:[%s1932_s23 + $0x40] sm:$0xff] %v1028_v3 }
 0x34f   : > { %v1412_v4 = vpop.f32.mrb[18].mxu1 }
 0x350   : > { %1078 = vst [vmem:[%s1932_s23 + $0x58] sm:$0xff] %v1412_v4  ;;  %v1038_v5 = vpop.f32.mrb[19].mxu1 }
 0x351   : > { %1077 = vst [vmem:[%s1932_s23 + $0x50] sm:$0xff] %v1038_v5 }
 0x353   : > { %v1415_v6 = vpop.f32.mrb[20].mxu1 }
 0x354   : > { %1080 = vst [vmem:[%s1932_s23 + $0x68] sm:$0xff] %v1415_v6  ;;  %v1048_v7 = vpop.f32.mrb[21].mxu1 }
 0x355   : > { %1079 = vst [vmem:[%s1932_s23 + $0x60] sm:$0xff] %v1048_v7 }
 0x357   : > { %v1418_v8 = vpop.f32.mrb[22].mxu1 }
 0x358   : > { %1082 = vst [vmem:[%s1932_s23 + $0x78] sm:$0xff] %v1418_v8  ;;  %v1058_v9 = vpop.f32.mrb[23].mxu1 }
 0x359   : > { %1081 = vst [vmem:[%s1932_s23 + $0x70] sm:$0xff] %v1058_v9 }
 0x35a PF: > { %s18_s27 = sadd.s32 1, %s1612_s27  }
 0x35b   : > { %p15_p4 = scmp.ge.s32.totalorder %s18_s27, 6  }
 0x35d   :  { %17 = sbr.rel (!%p15_p4) target bundleno = 1 (0x1), region = 82 }

</bundles_post_ra>
